<compile_context>
chip_gen: v5e
topology: v5e:2x2
jax: 0.10.0
libtpu: 0.0.40
codegen_flags: <defaults>
</compile_context>

<pallas_src>
import functools

import jax
import jax.numpy as jnp
from jax import lax
from jax.experimental import pallas as pl
from jax.experimental.pallas import tpu as pltpu


def _round_up(x, m):
    return (x + m - 1) // m * m


def _fast_embedding_kernel(ids_ref,   # SMEM : (B_pad * S,) int32 token ids
                           emb_ref,   # VMEM : (V, E_pad)
                           w1_ref,    # VMEM : (E_pad, H_pad)
                           b1_ref,    # VMEM : (1, H_pad)
                           w2_ref,    # VMEM : (H_pad, Vo_pad)
                           b2_ref,    # VMEM : (1, Vo_pad)
                           out_ref,   # VMEM : (TB, Vo_pad)
                           acc_ref,   # VMEM scratch: (TB, E_pad) f32
                           *, seq_len):
    i = pl.program_id(0)
    tb = out_ref.shape[0]
    e_pad = emb_ref.shape[1]

    # --- embedding gather + mean over the sequence ---------------------------
    # ids live in SMEM (scalar path, zero vector-side cost); each token's row
    # is gathered from the VMEM table and summed.  1/S is applied once, after
    # the sum (deferred scaling, matches gather-then-mean summation order).
    def batch_body(b, carry):
        base = (i * tb + b) * seq_len

        def seq_body(s, row):
            tok = ids_ref[base + s]
            return row + emb_ref[pl.ds(tok, 1), :]

        row_sum = lax.fori_loop(
            0, seq_len, seq_body,
            jnp.zeros((1, e_pad), jnp.float32),
            unroll=(seq_len <= 32))
        acc_ref[pl.ds(b, 1), :] = row_sum
        return carry

    lax.fori_loop(0, tb, batch_body, 0)

    embedded = acc_ref[...] * (1.0 / seq_len)             # (TB, E_pad)

    # --- hidden = relu(embedded @ W1 + b1) ------------------------------------
    hidden = jnp.dot(embedded, w1_ref[...],
                     preferred_element_type=jnp.float32) + b1_ref[...]
    hidden = jnp.maximum(hidden, 0.0)                     # (TB, H_pad)

    # --- out = hidden @ W2 + b2 ------------------------------------------------
    out = jnp.dot(hidden, w2_ref[...],
                  preferred_element_type=jnp.float32) + b2_ref[...]
    out_ref[...] = out.astype(out_ref.dtype)              # (TB, Vo_pad)


def fast_embedding_forward(src, emb_table, w1, b1, w2, b2):
    """src: (B, S) int token ids; emb_table: (V, E);
    w1: (E, H) pre-transposed, b1: (H,); w2: (H, V) pre-transposed, b2: (V,).
    Returns (B, V) float32, identical semantics to the PyTorch forward."""
    B, S = src.shape
    V, E = emb_table.shape
    H = w1.shape[1]
    V_out = w2.shape[1]

    # --- padding: lanes to 128, batch to a sublane/MXU-friendly tile ----------
    E_pad = _round_up(E, 128)
    H_pad = _round_up(H, 128)
    Vo_pad = _round_up(V_out, 128)

    TB = 128 if B >= 128 else _round_up(B, 8)
    B_pad = _round_up(B, TB)
    num_tiles = B_pad // TB

    f32 = jnp.float32
    emb_p = jnp.zeros((V, E_pad), f32).at[:, :E].set(emb_table.astype(f32))
    w1_p = jnp.zeros((E_pad, H_pad), f32).at[:E, :H].set(w1.astype(f32))
    b1_p = jnp.zeros((1, H_pad), f32).at[0, :H].set(b1.astype(f32))
    w2_p = jnp.zeros((H_pad, Vo_pad), f32).at[:H, :V_out].set(w2.astype(f32))
    b2_p = jnp.zeros((1, Vo_pad), f32).at[0, :V_out].set(b2.astype(f32))

    # Pad ids with a valid token (0); the padded batch rows are sliced off.
    ids = jnp.zeros((B_pad, S), jnp.int32).at[:B, :].set(src.astype(jnp.int32))
    ids_flat = ids.reshape(B_pad * S)          # 1D SMEM layout (minimal padding)

    grid_spec = pltpu.PrefetchScalarGridSpec(
        num_scalar_prefetch=1,
        grid=(num_tiles,),
        in_specs=[
            pl.BlockSpec((V, E_pad), lambda i, ids: (0, 0)),       # emb table
            pl.BlockSpec((E_pad, H_pad), lambda i, ids: (0, 0)),   # W1
            pl.BlockSpec((1, H_pad), lambda i, ids: (0, 0)),       # b1
            pl.BlockSpec((H_pad, Vo_pad), lambda i, ids: (0, 0)),  # W2
            pl.BlockSpec((1, Vo_pad), lambda i, ids: (0, 0)),      # b2
        ],
        out_specs=pl.BlockSpec((TB, Vo_pad), lambda i, ids: (i, 0)),
        scratch_shapes=[pltpu.VMEM((TB, E_pad), jnp.float32)],
    )

    # Explicit VMEM budget: blocks are double-buffered by the pipeline.
    weight_bytes = 4 * (V * E_pad + E_pad * H_pad + H_pad
                        + H_pad * Vo_pad + Vo_pad)
    io_bytes = 4 * (TB * Vo_pad + TB * E_pad)
    vmem_limit = min(max(2 * (weight_bytes + io_bytes) + (4 << 20), 16 << 20),
                     48 << 20)

    kernel = functools.partial(_fast_embedding_kernel, seq_len=S)

    out_pad = pl.pallas_call(
        kernel,
        out_shape=jax.ShapeDtypeStruct((B_pad, Vo_pad), jnp.float32),
        grid_spec=grid_spec,
        compiler_params=pltpu.CompilerParams(
            dimension_semantics=("parallel",),
            vmem_limit_bytes=vmem_limit,
        ),
    )(ids_flat, emb_p, w1_p, b1_p, w2_p, b2_p)

    return out_pad[:B, :V_out]


def reference_forward(src, emb_table, w1, b1, w2, b2):
    embedded = jnp.take(emb_table, src, axis=0)          # (B, S, E)
    embedded = embedded.mean(axis=1)                     # (B, E)
    hidden = jax.nn.relu(embedded @ w1 + b1)             # (B, H)
    return hidden @ w2 + b2                              # (B, V)


if __name__ == "__main__":
    # Small deterministic config (matches the module: vocab, embed, hidden).
    B, S = 2, 8            # batch, sequence length
    V, E, H = 128, 32, 32  # vocab_size, embed_size, hidden_size

    key = jax.random.PRNGKey(0)
    k_ids, k_emb, k_w1, k_b1, k_w2, k_b2 = jax.random.split(key, 6)

    src = jax.random.randint(k_ids, (B, S), 0, V, dtype=jnp.int32)

    # Parameters (deterministic init; linear weights stored as (in, out)).
    emb_table = jax.random.normal(k_emb, (V, E), dtype=jnp.float32)
    w1 = jax.random.normal(k_w1, (E, H), dtype=jnp.float32) * (1.0 / jnp.sqrt(E))
    b1 = jax.random.normal(k_b1, (H,), dtype=jnp.float32) * 0.01
    w2 = jax.random.normal(k_w2, (H, V), dtype=jnp.float32) * (1.0 / jnp.sqrt(H))
    b2 = jax.random.normal(k_b2, (V,), dtype=jnp.float32) * 0.01

    out = fast_embedding_forward(src, emb_table, w1, b1, w2, b2)
    out = jax.block_until_ready(out)

    ref = reference_forward(src, emb_table, w1, b1, w2, b2)
    assert out.shape == (B, V), out.shape
    max_err = float(jnp.max(jnp.abs(out - ref)))
    assert jnp.allclose(out, ref, atol=1e-4, rtol=1e-4), max_err

    print("KERNEL_OK")
</pallas_src>

<mosaic_0001>
module attributes {stable_mosaic.version = 11 : i64} {
  func.func @_fast_embedding_kernel(%arg0: i32, %arg1: memref<64xi32, #tpu.memory_space<smem>>, %arg2: memref<128x128xf32, #tpu.memory_space<vmem>>, %arg3: memref<128x128xf32, #tpu.memory_space<vmem>>, %arg4: memref<1x128xf32, #tpu.memory_space<vmem>>, %arg5: memref<128x128xf32, #tpu.memory_space<vmem>>, %arg6: memref<1x128xf32, #tpu.memory_space<vmem>>, %arg7: memref<8x128xf32, #tpu.memory_space<vmem>>, %arg8: memref<8x128xf32, #tpu.memory_space<vmem>>) attributes {dimension_semantics = [#tpu.dimension_semantics<parallel>], iteration_bounds = array<i64: 1>, scalar_prefetch = 1 : i64, scratch_operands = 1 : i64, tpu.core_type = #tpu.core_type<tc>, window_params = [{pipeline_mode = #tpu.pipeline_mode<synchronous>, transform_indices = @transform_0, window_bounds = array<i64: 128, 128>}, {pipeline_mode = #tpu.pipeline_mode<synchronous>, transform_indices = @transform_1, window_bounds = array<i64: 128, 128>}, {pipeline_mode = #tpu.pipeline_mode<synchronous>, transform_indices = @transform_2, window_bounds = array<i64: 1, 128>}, {pipeline_mode = #tpu.pipeline_mode<synchronous>, transform_indices = @transform_3, window_bounds = array<i64: 128, 128>}, {pipeline_mode = #tpu.pipeline_mode<synchronous>, transform_indices = @transform_4, window_bounds = array<i64: 1, 128>}, {transform_indices = @transform_5, window_bounds = array<i64: 8, 128>}]} {
    %c0_i32 = arith.constant 0 : i32
    %c8_i32 = arith.constant 8 : i32
    %0 = arith.addi %c0_i32, %c8_i32 : i32
    %c1_i32 = arith.constant 1 : i32
    scf.for %arg9 = %c0_i32 to %0 step %c1_i32  : i32 {
      %c8_i32_15 = arith.constant 8 : i32
      %17 = arith.muli %arg0, %c8_i32_15 : i32
      %18 = arith.addi %17, %arg9 : i32
      %c8_i32_16 = arith.constant 8 : i32
      %19 = arith.muli %18, %c8_i32_16 : i32
      %cst_17 = arith.constant 0.000000e+00 : f32
      %20 = vector.broadcast %cst_17 : f32 to vector<1x128xf32>
      %c0_i32_18 = arith.constant 0 : i32
      %21 = arith.addi %19, %c0_i32_18 : i32
      %22 = arith.index_cast %21 : i32 to index
      %23 = memref.load %arg1[%22] : memref<64xi32, #tpu.memory_space<smem>>
      %24 = arith.index_cast %23 : i32 to index
      %c0_19 = arith.constant 0 : index
      %25 = vector.load %arg2[%24, %c0_19] : memref<128x128xf32, #tpu.memory_space<vmem>>, vector<1x128xf32>
      %26 = arith.addf %20, %25 : vector<1x128xf32>
      %c1_i32_20 = arith.constant 1 : i32
      %27 = arith.addi %19, %c1_i32_20 : i32
      %28 = arith.index_cast %27 : i32 to index
      %29 = memref.load %arg1[%28] : memref<64xi32, #tpu.memory_space<smem>>
      %30 = arith.index_cast %29 : i32 to index
      %c0_21 = arith.constant 0 : index
      %31 = vector.load %arg2[%30, %c0_21] : memref<128x128xf32, #tpu.memory_space<vmem>>, vector<1x128xf32>
      %32 = arith.addf %26, %31 : vector<1x128xf32>
      %c2_i32 = arith.constant 2 : i32
      %33 = arith.addi %19, %c2_i32 : i32
      %34 = arith.index_cast %33 : i32 to index
      %35 = memref.load %arg1[%34] : memref<64xi32, #tpu.memory_space<smem>>
      %36 = arith.index_cast %35 : i32 to index
      %c0_22 = arith.constant 0 : index
      %37 = vector.load %arg2[%36, %c0_22] : memref<128x128xf32, #tpu.memory_space<vmem>>, vector<1x128xf32>
      %38 = arith.addf %32, %37 : vector<1x128xf32>
      %c3_i32 = arith.constant 3 : i32
      %39 = arith.addi %19, %c3_i32 : i32
      %40 = arith.index_cast %39 : i32 to index
      %41 = memref.load %arg1[%40] : memref<64xi32, #tpu.memory_space<smem>>
      %42 = arith.index_cast %41 : i32 to index
      %c0_23 = arith.constant 0 : index
      %43 = vector.load %arg2[%42, %c0_23] : memref<128x128xf32, #tpu.memory_space<vmem>>, vector<1x128xf32>
      %44 = arith.addf %38, %43 : vector<1x128xf32>
      %c4_i32 = arith.constant 4 : i32
      %45 = arith.addi %19, %c4_i32 : i32
      %46 = arith.index_cast %45 : i32 to index
      %47 = memref.load %arg1[%46] : memref<64xi32, #tpu.memory_space<smem>>
      %48 = arith.index_cast %47 : i32 to index
      %c0_24 = arith.constant 0 : index
      %49 = vector.load %arg2[%48, %c0_24] : memref<128x128xf32, #tpu.memory_space<vmem>>, vector<1x128xf32>
      %50 = arith.addf %44, %49 : vector<1x128xf32>
      %c5_i32 = arith.constant 5 : i32
      %51 = arith.addi %19, %c5_i32 : i32
      %52 = arith.index_cast %51 : i32 to index
      %53 = memref.load %arg1[%52] : memref<64xi32, #tpu.memory_space<smem>>
      %54 = arith.index_cast %53 : i32 to index
      %c0_25 = arith.constant 0 : index
      %55 = vector.load %arg2[%54, %c0_25] : memref<128x128xf32, #tpu.memory_space<vmem>>, vector<1x128xf32>
      %56 = arith.addf %50, %55 : vector<1x128xf32>
      %c6_i32 = arith.constant 6 : i32
      %57 = arith.addi %19, %c6_i32 : i32
      %58 = arith.index_cast %57 : i32 to index
      %59 = memref.load %arg1[%58] : memref<64xi32, #tpu.memory_space<smem>>
      %60 = arith.index_cast %59 : i32 to index
      %c0_26 = arith.constant 0 : index
      %61 = vector.load %arg2[%60, %c0_26] : memref<128x128xf32, #tpu.memory_space<vmem>>, vector<1x128xf32>
      %62 = arith.addf %56, %61 : vector<1x128xf32>
      %c7_i32 = arith.constant 7 : i32
      %63 = arith.addi %19, %c7_i32 : i32
      %64 = arith.index_cast %63 : i32 to index
      %65 = memref.load %arg1[%64] : memref<64xi32, #tpu.memory_space<smem>>
      %66 = arith.index_cast %65 : i32 to index
      %c0_27 = arith.constant 0 : index
      %67 = vector.load %arg2[%66, %c0_27] : memref<128x128xf32, #tpu.memory_space<vmem>>, vector<1x128xf32>
      %68 = arith.addf %62, %67 : vector<1x128xf32>
      %c8_i32_28 = arith.constant 8 : i32
      %69 = arith.index_cast %arg9 : i32 to index
      %c0_29 = arith.constant 0 : index
      %70 = vector.load %arg8[%69, %c0_29] : memref<8x128xf32, #tpu.memory_space<vmem>>, vector<1x128xf32>
      tpu.vector_store %arg8[%69, %c0_29], %68 {strides = array<i32>} : memref<8x128xf32, #tpu.memory_space<vmem>>, vector<1x128xf32>,
    }
    %c8_i32_0 = arith.constant 8 : i32
    %c0 = arith.constant 0 : index
    %c0_1 = arith.constant 0 : index
    %1 = vector.load %arg8[%c0, %c0_1] : memref<8x128xf32, #tpu.memory_space<vmem>>, vector<8x128xf32>
    %cst = arith.constant 1.250000e-01 : f32
    %2 = vector.broadcast %cst : f32 to vector<8x128xf32>
    %3 = arith.mulf %1, %2 : vector<8x128xf32>
    %c0_2 = arith.constant 0 : index
    %c0_3 = arith.constant 0 : index
    %4 = vector.load %arg3[%c0_2, %c0_3] : memref<128x128xf32, #tpu.memory_space<vmem>>, vector<128x128xf32>
    %cst_4 = arith.constant dense<0.000000e+00> : vector<8x128xf32>
    %5 = tpu.matmul %3, %4, %cst_4 {dimension_numbers = #tpu.dot_dimension_numbers<[1], [0], [0], [1], [0, 0, 1, 1], [], []>} : vector<8x128xf32>, vector<128x128xf32>, vector<8x128xf32> -> vector<8x128xf32>
    %c0_5 = arith.constant 0 : index
    %c0_6 = arith.constant 0 : index
    %6 = vector.load %arg4[%c0_5, %c0_6] : memref<1x128xf32, #tpu.memory_space<vmem>>, vector<1x128xf32>
    %7 = vector.broadcast %6 : vector<1x128xf32> to vector<8x128xf32>
    %8 = arith.addf %5, %7 : vector<8x128xf32>
    %cst_7 = arith.constant 0.000000e+00 : f32
    %9 = vector.broadcast %cst_7 : f32 to vector<8x128xf32>
    %10 = arith.maximumf %8, %9 : vector<8x128xf32>
    %c0_8 = arith.constant 0 : index
    %c0_9 = arith.constant 0 : index
    %11 = vector.load %arg5[%c0_8, %c0_9] : memref<128x128xf32, #tpu.memory_space<vmem>>, vector<128x128xf32>
    %cst_10 = arith.constant dense<0.000000e+00> : vector<8x128xf32>
    %12 = tpu.matmul %10, %11, %cst_10 {dimension_numbers = #tpu.dot_dimension_numbers<[1], [0], [0], [1], [0, 0, 1, 1], [], []>} : vector<8x128xf32>, vector<128x128xf32>, vector<8x128xf32> -> vector<8x128xf32>
    %c0_11 = arith.constant 0 : index
    %c0_12 = arith.constant 0 : index
    %13 = vector.load %arg6[%c0_11, %c0_12] : memref<1x128xf32, #tpu.memory_space<vmem>>, vector<1x128xf32>
    %14 = vector.broadcast %13 : vector<1x128xf32> to vector<8x128xf32>
    %15 = arith.addf %12, %14 : vector<8x128xf32>
    %c0_13 = arith.constant 0 : index
    %c0_14 = arith.constant 0 : index
    %16 = vector.load %arg7[%c0_13, %c0_14] : memref<8x128xf32, #tpu.memory_space<vmem>>, vector<8x128xf32>
    tpu.vector_store %arg7[%c0_13, %c0_14], %15 {strides = array<i32>} : memref<8x128xf32, #tpu.memory_space<vmem>>, vector<8x128xf32>,
    return
  }
  func.func @transform_0(%arg0: i32, %arg1: memref<64xi32, #tpu.memory_space<smem>>) -> (i32, i32) {
    %c0_i32 = arith.constant 0 : i32
    %c0_i32_0 = arith.constant 0 : i32
    %c0_i32_1 = arith.constant 0 : i32
    return %c0_i32, %c0_i32_0 : i32, i32
  }
  func.func @transform_1(%arg0: i32, %arg1: memref<64xi32, #tpu.memory_space<smem>>) -> (i32, i32) {
    %c0_i32 = arith.constant 0 : i32
    %c0_i32_0 = arith.constant 0 : i32
    %c0_i32_1 = arith.constant 0 : i32
    return %c0_i32, %c0_i32_0 : i32, i32
  }
  func.func @transform_2(%arg0: i32, %arg1: memref<64xi32, #tpu.memory_space<smem>>) -> (i32, i32) {
    %c0_i32 = arith.constant 0 : i32
    %c0_i32_0 = arith.constant 0 : i32
    %c0_i32_1 = arith.constant 0 : i32
    return %c0_i32, %c0_i32_0 : i32, i32
  }
  func.func @transform_3(%arg0: i32, %arg1: memref<64xi32, #tpu.memory_space<smem>>) -> (i32, i32) {
    %c0_i32 = arith.constant 0 : i32
    %c0_i32_0 = arith.constant 0 : i32
    %c0_i32_1 = arith.constant 0 : i32
    return %c0_i32, %c0_i32_0 : i32, i32
  }
  func.func @transform_4(%arg0: i32, %arg1: memref<64xi32, #tpu.memory_space<smem>>) -> (i32, i32) {
    %c0_i32 = arith.constant 0 : i32
    %c0_i32_0 = arith.constant 0 : i32
    %c0_i32_1 = arith.constant 0 : i32
    return %c0_i32, %c0_i32_0 : i32, i32
  }
  func.func @transform_5(%arg0: i32, %arg1: memref<64xi32, #tpu.memory_space<smem>>) -> (i32, i32) {
    %c0_i32 = arith.constant 0 : i32
    %c0_i32_0 = arith.constant 0 : i32
    return %arg0, %c0_i32 : i32, i32
  }
}

</mosaic_0001>

<bundles_post_ra>
// kernel: tpu_custom_call.1
= control target key start
LH: loop header
LB: loop body
LE: loop exit
PB: predicated region body
PF: predicated region fallthrough
CT: control target
= control target key end

     0   :  { %s385_s24 = smov [#allocation4]   ;;  %s458_s0 = inlined_call_operand.hbm [shape: s32[64], index: 0, kind: input, shape index: {}]   ;;  %s459_s1 = inlined_call_operand.hbm [shape: f32[128,128], index: 1, kind: input, shape index: {}]   ;;  %s460_s2 = inlined_call_operand.hbm [shape: f32[128,128], index: 2, kind: input, shape index: {}]   ;;  %s461_s3 = inlined_call_operand.vmem [shape: f32[1,128], index: 3, kind: input, shape index: {}]   ;;  %s462_s4 = inlined_call_operand.hbm [shape: f32[128,128], index: 4, kind: input, shape index: {}]   ;;  %s463_s5 = inlined_call_operand.vmem [shape: f32[1,128], index: 5, kind: input, shape index: {}]   ;;  %s464_s6 = inlined_call_operand.hbm [shape: f32[8,128], index: 6, kind: output, shape index: {}]  }
   0x1   :  { %s12_s23 = sshll.u32 %s458_s0, 4  ;;  %s13_s23 = int_to_ptr.hbm [resolvable:$true] %s12_s23 }
   0x2   :  { %15 = dma.hbm_to_smem %s13_s23, 16, %s385_s24, [#allocation3] }
   0x3   :  { %373 = dma.done.wait [#allocation3], 16 }
   0x4   :  { %374 = vsyncadd [#allocation3], 4294967280 }
   0x5   :  { %18 = sfence }
   0x6   :  { %19 = vsyncpa [#allocation6], 0 }
   0x7   :  { %20 = vsyncpa [#allocation9], 0 }
   0x8   :  { %21 = vsyncpa [#allocation7], 0  ;;  %s39_s27 = sshll.u32 %s460_s2, 4  ;;  %s386_s28 = smov [#allocation8]   ;;  %s40_s27 = int_to_ptr.hbm [resolvable:$true] %s39_s27 }
   0x9   :  { %s41_s29 = sshll.u32 %s386_s28, 4  ;;  %s26_s0 = sshll.u32 %s459_s1, 4  ;;  %s42_s29 = int_to_ptr.vmem [resolvable:$true] %s41_s29  ;;  %s27_s0 = int_to_ptr.hbm [resolvable:$true] %s26_s0 }
   0xa   :  { %s387_s8 = smov 128   ;;  %s388_s9 = smov 8  }
   0xb   :  { %47 = dma.hbm_to_vmem [thread:$0]  %s40_s27, 2048, %s42_s29, [#allocation9], %s387_s8, %s387_s8, %s388_s9  }
   0xc   :  { %s389_s10 = smov [#allocation5]   ;;  %s54_s14 = sshll.u32 %s462_s4, 4  ;;  %s55_s14 = int_to_ptr.hbm [resolvable:$true] %s54_s14 }
   0xd   :  { %s28_s11 = sshll.u32 %s389_s10, 4  ;;  %s390_s2 = smov [#allocation10]   ;;  %s29_s11 = int_to_ptr.vmem [resolvable:$true] %s28_s11 }
   0xe   :  { %34 = dma.hbm_to_vmem [thread:$0]  %s27_s0, 2048, %s29_s11, [#allocation6], %s387_s8, %s387_s8, %s388_s9  }
   0xf   :  { %s56_s15 = sshll.u32 %s390_s2, 4  ;;  %s57_s15 = int_to_ptr.vmem [resolvable:$true] %s56_s15 }
  0x10   :  { %62 = dma.hbm_to_vmem [thread:$0]  %s55_s14, 2048, %s57_s15, [#allocation9], %s387_s8, %s387_s8, %s388_s9  }
  0x11   :  { %375 = dma.done.wait [#allocation6], 2048  }
  0x12   :  { %376 = vsyncadd [#allocation6], 4294965248 }
  0x13   :  { %377 = dma.done.wait [#allocation9], 4096  }
  0x14   :  { %378 = vsyncadd [#allocation9], 4294963200  ;;  %s439_s1 = smov 0  }
  0x15 LB: > { %s243_s4 = sshll.u32 %s383_s1, 3  ;;  %s125_s14 = scalar_lea.vmem [#allocation2], %s383_s1  ;;  %s383_s1 = sphi %s439_s1, %s82_s1  }
  0x16   : > { %s86_s16 = sld [smem:[#allocation4 + %s243_s4]]  ;;  %s90_s17 = sadd.s32 1, %s243_s4 }
  0x17   : > { %s91_s18 = sld [smem:[#allocation4 + %s90_s17]]  ;;  %s95_s19 = sadd.s32 2, %s243_s4 }
  0x18   : > { %s96_s20 = sld [smem:[#allocation4 + %s95_s19]]  ;;  %s100_s21 = sadd.s32 3, %s243_s4 }
  0x19   : > { %s101_s22 = sld [smem:[#allocation4 + %s100_s21]]  ;;  %s105_s23 = sadd.s32 4, %s243_s4 }
  0x1a   : > { %s106_s24 = sld [smem:[#allocation4 + %s105_s23]]  ;;  %s110_s25 = sadd.s32 5, %s243_s4 }
  0x1b   : > { %s111_s26 = sld [smem:[#allocation4 + %s110_s25]]  ;;  %s115_s27 = sadd.s32 6, %s243_s4 }
  0x1c   : > { %s116_s28 = sld [smem:[#allocation4 + %s115_s27]]  ;;  %s87_s29 = scalar_lea.vmem [#allocation5], %s86_s16 }
  0x1d   : > { %v88_v0 = vld [vmem:[%s87_s29] sm:$0x1]  ;;  %s120_s30 = sadd.s32 7, %s243_s4  ;;  %s92_s7 = scalar_lea.vmem [#allocation5], %s91_s18 }
  0x1e   : > { %v93_v1 = vld [vmem:[%s92_s7] sm:$0x1]  ;;  %s121_s0 = sld [smem:[#allocation4 + %s120_s30]]  ;;  %s97_s8 = scalar_lea.vmem [#allocation5], %s96_s20 }
  0x1f   : > { %v94_v2 = vadd.f32 %v93_v1, %v88_v0  ;;  %v98_v3 = vld [vmem:[%s97_s8] sm:$0x1]  ;;  %s102_s9 = scalar_lea.vmem [#allocation5], %s101_s22  ;;  %s82_s1 = sadd.s32 1, %s383_s1  }
  0x20   : > { %v103_v4 = vld [vmem:[%s102_s9] sm:$0x1]  ;;  %s107_s10 = scalar_lea.vmem [#allocation5], %s106_s24  ;;  %p79_p0 = scmp.ge.s32.totalorder %s82_s1, 8  }
  0x21   : > { %v99_v5 = vadd.f32 %v98_v3, %v94_v2  ;;  %v108_v6 = vld [vmem:[%s107_s10] sm:$0x1]  ;;  %s112_s11 = scalar_lea.vmem [#allocation5], %s111_s26  ;;  %v143_v16 = vld [vmem:[#allocation8 + $0x70] sm:$0xff] (%p79_p0)  ;;  %v142_v17 = vld [vmem:[#allocation8 + $0x68] sm:$0xff] (%p79_p0)  ;;  %s391_s16 = smov (%p79_p0), [#allocation11]  }
  0x22   : > { %v113_v8 = vld [vmem:[%s112_s11] sm:$0x1]  ;;  %s117_s12 = scalar_lea.vmem [#allocation5], %s116_s28  ;;  %v141_v18 = vld [vmem:[#allocation8 + $0x60] sm:$0xff] (%p79_p0)  ;;  %v184_v21 = vld [vmem:[#allocation10 + $0x70] sm:$0xff] (%p79_p0)  ;;  %s216_s17 = sshll.u32 (%p79_p0), %s391_s16, 4  ;;  %s217_s17 = int_to_ptr.vmem [resolvable:$true] %s216_s17 }
  0x23   : > { %v104_v7 = vadd.f32 %v103_v4, %v99_v5  ;;  %v118_v10 = vld [vmem:[%s117_s12] sm:$0x1]  ;;  %v183_v22 = vld [vmem:[#allocation10 + $0x68] sm:$0xff] (%p79_p0)  ;;  %v139_v23 = vld [vmem:[#allocation8 + $0x50] sm:$0xff] (%p79_p0)  ;;  %s218_s20 = sshll.u32 (%p79_p0), %s464_s6, 4  ;;  %s219_s20 = int_to_ptr.hbm [resolvable:$true] %s218_s20 }
  0x24   : > { %s122_s13 = scalar_lea.vmem [#allocation5], %s121_s0  ;;  %v144_v15 = vld [vmem:[#allocation8 + $0x78] sm:$0xff] (%p79_p0)  ;;  %v182_v24 = vld [vmem:[#allocation10 + $0x60] sm:$0xff] (%p79_p0)  ;;  %v138_v25 = vld [vmem:[#allocation8 + $0x48] sm:$0xff] (%p79_p0) }
  0x25   : > { %v109_v9 = vadd.f32 %v108_v6, %v104_v7  ;;  %v123_v12 = vld [vmem:[%s122_s13] sm:$0x1]  ;;  %149 = vmatpush.msra.mxu0 (%p79_p0), %v144_v15  ;;  %v137_v27 = vld [vmem:[#allocation8 + $0x40] sm:$0xff] (%p79_p0)  ;;  %v180_v28 = vld [vmem:[#allocation10 + $0x50] sm:$0xff] (%p79_p0) }
  0x26   :  { %v185_v19 = vld [vmem:[#allocation10 + $0x78] sm:$0xff] (%p79_p0)  ;;  %v179_v30 = vld [vmem:[#allocation10 + $0x48] sm:$0xff] (%p79_p0)  ;;  %v135_v31 = vld [vmem:[#allocation8 + $0x30] sm:$0xff] (%p79_p0) }
  0x27   : > { %v114_v11 = vadd.f32 %v113_v8, %v109_v9  ;;  %150 = vmatpush.msra.mxu0 (%p79_p0), %v143_v16  ;;  %v140_v20 = vld [vmem:[#allocation8 + $0x58] sm:$0xff] (%p79_p0)  ;;  %190 = vmatpush.msra.mxu1 (%p79_p0), %v185_v19  ;;  %v178_v32 = vld [vmem:[#allocation10 + $0x40] sm:$0xff] (%p79_p0)  ;;  %v134_v33 = vld [vmem:[#allocation8 + $0x28] sm:$0xff] (%p79_p0) }
  0x28   :  { %v181_v26 = vld [vmem:[#allocation10 + $0x58] sm:$0xff] (%p79_p0)  ;;  %v133_v35 = vld [vmem:[#allocation8 + $0x20] sm:$0xff] (%p79_p0)  ;;  %v176_v36 = vld [vmem:[#allocation10 + $0x30] sm:$0xff] (%p79_p0) }
  0x29   : > { %v119_v13 = vadd.f32 %v118_v10, %v114_v11  ;;  %81 = sbr.rel (!%p79_p0) target bundleno = 21 (0x15), region = 68  ;;  %151 = vmatpush.msra.mxu0 (%p79_p0), %v142_v17  ;;  %191 = vmatpush.msra.mxu1 (%p79_p0), %v184_v21  ;;  %v136_v29 = vld [vmem:[#allocation8 + $0x38] sm:$0xff] (%p79_p0)  ;;  %v175_v38 = vld [vmem:[#allocation10 + $0x28] sm:$0xff] (%p79_p0)  ;;  %v131_v39 = vld [vmem:[#allocation8 + $0x10] sm:$0xff] (%p79_p0) }
  0x2a   :  { %v177_v34 = vld [vmem:[#allocation10 + $0x38] sm:$0xff] (%p79_p0)  ;;  %v174_v41 = vld [vmem:[#allocation10 + $0x20] sm:$0xff] (%p79_p0)  ;;  %v130_v42 = vld [vmem:[#allocation8 + $0x8] sm:$0xff] (%p79_p0) }
  0x2b   : > { %v124_v14 = vadd.f32 %v123_v12, %v119_v13  ;;  %152 = vmatpush.msra.mxu0 (%p79_p0), %v141_v18  ;;  %192 = vmatpush.msra.mxu1 (%p79_p0), %v183_v22  ;;  %v132_v37 = vld [vmem:[#allocation8 + $0x18] sm:$0xff] (%p79_p0)  ;;  %v129_v44 = vld [vmem:[#allocation8] sm:$0xff] (%p79_p0)  ;;  %v172_v46 = vld [vmem:[#allocation10 + $0x10] sm:$0xff] (%p79_p0) }
  0x2c   :  { %v173_v43 = vld [vmem:[#allocation10 + $0x18] sm:$0xff] (%p79_p0)  ;;  %v171_v47 = vld [vmem:[#allocation10 + $0x8] sm:$0xff] (%p79_p0)  ;;  %v170_v48 = vld [vmem:[#allocation10] sm:$0xff] (%p79_p0) }
  0x2d   : > { %126 = vst [vmem:[%s125_s14] sm:$0x1] %v124_v14  ;;  %153 = vmatpush.msra.mxu0 (%p79_p0), %v140_v20  ;;  %193 = vmatpush.msra.mxu1 (%p79_p0), %v182_v24  ;;  %v259_v49 = vld [vmem:[%s461_s3] ss:$0 sm:$0xff] (%p79_p0) }
  0x2e   :  { %v260_v53 = vld [vmem:[%s463_s5] ss:$0 sm:$0xff] }
  0x2f   :  { %154 = vmatpush.msra.mxu0 %v139_v23  ;;  %194 = vmatpush.msra.mxu1 %v181_v26 }
  0x31   :  { %155 = vmatpush.msra.mxu0 %v138_v25  ;;  %195 = vmatpush.msra.mxu1 %v180_v28 }
  0x33   :  { %156 = vmatpush.msra.mxu0 %v137_v27  ;;  %196 = vmatpush.msra.mxu1 %v179_v30 }
  0x34   :  { %v127_v40 = vld [vmem:[#allocation2] sm:$0xff] }
  0x35   :  { %157 = vmatpush.msra.mxu0 %v136_v29  ;;  %197 = vmatpush.msra.mxu1 %v178_v32  ;;  %v128_v45 = vmul.f32 0.125, %v127_v40 }
  0x37   :  { %158 = vmatpush.msra.mxu0 %v135_v31  ;;  %198 = vmatpush.msra.mxu1 %v177_v34 }
  0x39   :  { %159 = vmatpush.msra.mxu0 %v134_v33  ;;  %199 = vmatpush.msra.mxu1 %v176_v36 }
  0x3b   :  { %160 = vmatpush.msra.mxu0 %v133_v35  ;;  %200 = vmatpush.msra.mxu1 %v175_v38 }
  0x3d   :  { %161 = vmatpush.msra.mxu0 %v132_v37  ;;  %201 = vmatpush.msra.mxu1 %v174_v41 }
  0x3f   :  { %162 = vmatpush.msra.mxu0 %v131_v39  ;;  %202 = vmatpush.msra.mxu1 %v173_v43 }
  0x41   :  { %163 = vmatpush.msra.mxu0 %v130_v42  ;;  %203 = vmatpush.msra.mxu1 %v172_v46 }
  0x43   :  { %164 = vmatpush.msra.mxu0 %v129_v44  ;;  %204 = vmatpush.msra.mxu1 %v171_v47 }
  0x44   :  { %165 = vmatmul.f32.vlgmr.msra.gmra.mxu0 %v128_v45 }
  0x45   :  { %205 = vmatpush.msra.mxu1 %v170_v48 }
  0xc1   :  { %v166_v50 = vpop.f32.mrf.mxu0 }
  0xc2   :  { %v167_v51 = vadd.f32 %v259_v49, %v166_v50 }
  0xc4   :  { %v169_v52 = vmax.f32 %v167_v51, 0.0 }
  0xc6   :  { %206 = vmatmul.f32.vlgmr.msra.gmra.mxu1 %v169_v52 }
 0x143   :  { %v207_v54 = vpop.f32.mrf.mxu1 }
 0x144   :  { %v208_v55 = vadd.f32 %v260_v53, %v207_v54 }
 0x146   :  { %210 = vst [vmem:[#allocation11] sm:$0xff] %v208_v55 }
 0x147   :  { %221 = dma.vmem_to_hbm [thread:$0]  %s217_s17, 128, %s219_s20, [#allocation7]  }
 0x148   :  { %379 = dma.done.wait [#allocation7], 128  }
 0x149   :  { %380 = vsyncadd [#allocation7], 4294967168 }
 0x14a   :  { %226 = vsyncpa [#allocation6], 1 }
 0x14b   :  { %227 = vsyncpa [#allocation9], 1 }
 0x14c   :  { %228 = vsyncpa [#allocation7], 1 }

</bundles_post_ra>
